<compile_context>
chip_gen: v6e
topology: v6e:2x2x1
jax: 0.10.0
libtpu: 0.0.40
codegen_flags: <defaults>
</compile_context>

<pallas_src>
import jax
import jax.numpy as jnp
from jax import lax
from jax.experimental import pallas as pl
from jax.experimental.pallas import tpu as pltpu


def rnn_sequence_kernel(x_ref, h0_ref, wxh_ref, wxo_ref, whh_ref, who_ref,
                        bh_ref, bo_ref, out_ref, hT_ref, zxh_ref, hprev_ref):
    """Runs T RNN steps inside one kernel.

    x_ref   : (T*B, I)   all inputs, time-major rows           VMEM
    h0_ref  : (B, H)     initial hidden                        VMEM
    wxh_ref : (I, H)     i2h weight, input columns
    wxo_ref : (I, O)     i2o weight, input columns
    whh_ref : (H, H)     i2h weight, hidden columns
    who_ref : (H, O)     i2o weight, hidden columns
    bh_ref  : (1, H)     i2h bias
    bo_ref  : (1, O)     i2o bias
    out_ref : (T*B, O)   per-step LogSoftmax outputs
    hT_ref  : (B, H)     final hidden state
    zxh_ref : (T*B, H)   scratch: hoisted x-side i2h contribution
    hprev_ref:(T*B, H)   scratch: h_{t-1} for every step (for the i2o path)
    """
    B, H = h0_ref.shape
    T = x_ref.shape[0] // B

    x_all = x_ref[...]                                  # (T*B, I), read once

    # ---- Hoisted, batched x-side i2h contribution (off the serial path) ----
    zxh_ref[...] = (jnp.dot(x_all, wxh_ref[...],
                            preferred_element_type=jnp.float32)
                    + bh_ref[...])                      # (T*B, H)

    whh = whh_ref[...]                                  # read once, reused

    # ---- Serial recurrence: only the hidden-state path ---------------------
    def step(t, h):
        r0 = t * B
        hprev_ref[pl.ds(r0, B), :] = h                  # stash h_{t-1}
        return (zxh_ref[pl.ds(r0, B), :]
                + jnp.dot(h, whh, preferred_element_type=jnp.float32))

    unroll = T if T <= 16 else 8
    h_final = lax.fori_loop(0, T, step, h0_ref[...].astype(jnp.float32),
                            unroll=unroll)
    hT_ref[...] = h_final.astype(hT_ref.dtype)

    # ---- Post-loop batched i2o + LogSoftmax over all steps at once ---------
    # Reference computes logits from cat(x_t, h_{t-1}), i.e. the PRE-update
    # hidden, which is exactly what hprev_ref holds.
    logits = (jnp.dot(x_all, wxo_ref[...], preferred_element_type=jnp.float32)
              + jnp.dot(hprev_ref[...], who_ref[...],
                        preferred_element_type=jnp.float32)
              + bo_ref[...])                            # (T*B, O)
    m = jnp.max(logits, axis=1, keepdims=True)
    shifted = logits - m
    lse = jnp.log(jnp.sum(jnp.exp(shifted), axis=1, keepdims=True))
    out_ref[...] = (shifted - lse).astype(out_ref.dtype)


def prepare_params(w_i2h, b_i2h, w_i2o, b_i2o, input_size):
    """One-time re-layout of PyTorch nn.Linear weights (outside hot path).

    Splits the concat dimension (input vs hidden columns) and transposes to
    (in_features, out_features).  Kept as separate blocks so the kernel never
    needs lane-offset slices.
    """
    wxh = w_i2h[:, :input_size].T       # (I, H)
    whh = w_i2h[:, input_size:].T       # (H, H)
    wxo = w_i2o[:, :input_size].T       # (I, O)
    who = w_i2o[:, input_size:].T       # (H, O)
    bh = b_i2h[None, :]                 # (1, H)
    bo = b_i2o[None, :]                 # (1, O)
    return wxh, wxo, whh, who, bh, bo


@jax.jit
def rnn_sequence_forward(xs, h0, wxh, wxo, whh, who, bh, bo):
    """Run the RNN over a whole sequence in ONE pallas_call.

    xs: (T, B, input_size); h0: (B, hidden_size)
    Returns (log_probs (T, B, output_size), final hidden (B, hidden_size)).
    """
    T, B, I = xs.shape
    H = h0.shape[1]
    O = wxo.shape[1]

    x2d = xs.reshape(T * B, I)          # layout plumbing outside the kernel
    vmem = pltpu.MemorySpace.VMEM
    cost = pl.CostEstimate(
        flops=2 * T * B * (I + H) * (H + O),
        transcendentals=T * B * (O + 1),
        bytes_accessed=4 * (xs.size + h0.size + wxh.size + wxo.size
                            + whh.size + who.size + bh.size + bo.size
                            + T * B * O + B * H),
    )
    out2d, hT = pl.pallas_call(
        rnn_sequence_kernel,
        out_shape=(jax.ShapeDtypeStruct((T * B, O), jnp.float32),
                   jax.ShapeDtypeStruct((B, H), jnp.float32)),
        in_specs=[pl.BlockSpec(memory_space=vmem)] * 8,
        out_specs=(pl.BlockSpec(memory_space=vmem),
                   pl.BlockSpec(memory_space=vmem)),
        scratch_shapes=[pltpu.VMEM((T * B, H), jnp.float32),   # zxh
                        pltpu.VMEM((T * B, H), jnp.float32)],  # hprev
        cost_estimate=cost,
    )(x2d, h0, wxh, wxo, whh, who, bh, bo)
    return out2d.reshape(T, B, O), hT


@jax.jit
def rnn_forward(x, h, wxh, wxo, whh, who, bh, bo):
    """Single-step API matching the module's forward(input, hidden)."""
    out_seq, h_new = rnn_sequence_forward(x[None], h, wxh, wxo, whh, who, bh, bo)
    return out_seq[0], h_new


def reference_step(x, h, w_i2h, b_i2h, w_i2o, b_i2o):
    """Pure-JAX replica of the PyTorch module's forward (single step)."""
    combined = jnp.concatenate([x, h], axis=1)
    hidden_new = combined @ w_i2h.T + b_i2h
    output = jax.nn.log_softmax(combined @ w_i2o.T + b_i2o, axis=1)
    return output, hidden_new


def reference_sequence(xs, h0, w_i2h, b_i2h, w_i2o, b_i2o):
    h = h0
    outs = []
    for t in range(xs.shape[0]):
        o, h = reference_step(xs[t], h, w_i2h, b_i2h, w_i2o, b_i2o)
        outs.append(o)
    return jnp.stack(outs, axis=0), h


if __name__ == "__main__":
    # Sizes implied by the module config (kept small): input=16, hidden=32, output=8.
    B, T = 2, 8
    input_size, hidden_size, output_size = 16, 32, 8
    concat_size = input_size + hidden_size

    key = jax.random.PRNGKey(0)
    k0, k1, k2, k3, k4 = jax.random.split(key, 5)

    # Deterministic synthetic parameters (PyTorch nn.Linear layout: (out, in)).
    bound = 1.0 / jnp.sqrt(concat_size)
    w_i2h = jax.random.uniform(k0, (hidden_size, concat_size), jnp.float32, -bound, bound)
    b_i2h = jax.random.uniform(k1, (hidden_size,), jnp.float32, -bound, bound)
    w_i2o = jax.random.uniform(k2, (output_size, concat_size), jnp.float32, -bound, bound)
    b_i2o = jax.random.uniform(k3, (output_size,), jnp.float32, -bound, bound)

    xs = jax.random.normal(k4, (T, B, input_size), jnp.float32)
    h0 = jnp.zeros((B, hidden_size), jnp.float32)   # initHidden()-style zeros

    # One-time weight re-layout (outside the per-step hot path).
    wxh, wxo, whh, who, bh, bo = prepare_params(w_i2h, b_i2h, w_i2o, b_i2o, input_size)

    # Whole sequence in a single pallas_call.
    out_seq, h_final = rnn_sequence_forward(xs, h0, wxh, wxo, whh, who, bh, bo)
    jax.block_until_ready((out_seq, h_final))

    out_ref, h_ref = reference_sequence(xs, h0, w_i2h, b_i2h, w_i2o, b_i2o)
    assert out_seq.shape == (T, B, output_size) and h_final.shape == (B, hidden_size)
    # Accumulation order differs from cat(x,h)@W.T (split matmuls), so compare
    # with a tolerance, not bit-exactly.
    assert jnp.allclose(out_seq, out_ref, atol=1e-5, rtol=1e-5)
    assert jnp.allclose(h_final, h_ref, atol=1e-5, rtol=1e-5)
    # LogSoftmax rows should sum to 1 in probability space.
    assert jnp.allclose(jnp.sum(jnp.exp(out_seq), axis=-1), 1.0, atol=1e-5)

    # Single-step forward matching the module's forward(input, hidden) signature.
    out1, h1 = rnn_forward(xs[0], h0, wxh, wxo, whh, who, bh, bo)
    jax.block_until_ready((out1, h1))
    out1_ref, h1_ref = reference_step(xs[0], h0, w_i2h, b_i2h, w_i2o, b_i2o)
    assert jnp.allclose(out1, out1_ref, atol=1e-5, rtol=1e-5)
    assert jnp.allclose(h1, h1_ref, atol=1e-5, rtol=1e-5)

    # TODO(synk): nn.CrossEntropyLoss and the forward_counter print are training/debug glue, not part of the forward compute.
    print("KERNEL_OK")
</pallas_src>

<mosaic_0001>
module attributes {stable_mosaic.version = 11 : i64} {
  func.func @rnn_sequence_kernel(%arg0: memref<16x16xf32, #tpu.memory_space<vmem>>, %arg1: memref<2x32xf32, #tpu.memory_space<vmem>>, %arg2: memref<16x32xf32, #tpu.memory_space<vmem>>, %arg3: memref<16x8xf32, #tpu.memory_space<vmem>>, %arg4: memref<32x32xf32, #tpu.memory_space<vmem>>, %arg5: memref<32x8xf32, #tpu.memory_space<vmem>>, %arg6: memref<1x32xf32, #tpu.memory_space<vmem>>, %arg7: memref<1x8xf32, #tpu.memory_space<vmem>>, %arg8: memref<16x8xf32, #tpu.memory_space<vmem>>, %arg9: memref<2x32xf32, #tpu.memory_space<vmem>>, %arg10: memref<16x32xf32, #tpu.memory_space<vmem>>, %arg11: memref<16x32xf32, #tpu.memory_space<vmem>>) attributes {dimension_semantics = [], scalar_prefetch = 0 : i64, scratch_operands = 2 : i64, tpu.core_type = #tpu.core_type<tc>} {
    %c0 = arith.constant 0 : index
    %c0_0 = arith.constant 0 : index
    %0 = vector.load %arg0[%c0, %c0_0] : memref<16x16xf32, #tpu.memory_space<vmem>>, vector<16x16xf32>
    %c0_1 = arith.constant 0 : index
    %c0_2 = arith.constant 0 : index
    %1 = vector.load %arg2[%c0_1, %c0_2] : memref<16x32xf32, #tpu.memory_space<vmem>>, vector<16x32xf32>
    %cst = arith.constant dense<0.000000e+00> : vector<16x32xf32>
    %2 = tpu.matmul %0, %1, %cst {dimension_numbers = #tpu.dot_dimension_numbers<[1], [0], [0], [1], [0, 0, 1, 1], [], []>} : vector<16x16xf32>, vector<16x32xf32>, vector<16x32xf32> -> vector<16x32xf32>
    %c0_3 = arith.constant 0 : index
    %c0_4 = arith.constant 0 : index
    %3 = vector.load %arg6[%c0_3, %c0_4] : memref<1x32xf32, #tpu.memory_space<vmem>>, vector<1x32xf32>
    %4 = vector.broadcast %3 : vector<1x32xf32> to vector<16x32xf32>
    %5 = arith.addf %2, %4 : vector<16x32xf32>
    %c0_5 = arith.constant 0 : index
    %c0_6 = arith.constant 0 : index
    %6 = vector.load %arg10[%c0_5, %c0_6] : memref<16x32xf32, #tpu.memory_space<vmem>>, vector<16x32xf32>
    tpu.vector_store %arg10[%c0_5, %c0_6], %5 {strides = array<i32>} : memref<16x32xf32, #tpu.memory_space<vmem>>, vector<16x32xf32>,
    %c0_7 = arith.constant 0 : index
    %c0_8 = arith.constant 0 : index
    %7 = vector.load %arg4[%c0_7, %c0_8] : memref<32x32xf32, #tpu.memory_space<vmem>>, vector<32x32xf32>
    %c0_9 = arith.constant 0 : index
    %c0_10 = arith.constant 0 : index
    %8 = vector.load %arg1[%c0_9, %c0_10] : memref<2x32xf32, #tpu.memory_space<vmem>>, vector<2x32xf32>
    %c0_i32 = arith.constant 0 : i32
    %c2_i32 = arith.constant 2 : i32
    %9 = arith.muli %c0_i32, %c2_i32 : i32
    %10 = arith.index_cast %9 : i32 to index
    %c0_11 = arith.constant 0 : index
    %11 = vector.load %arg11[%10, %c0_11] : memref<16x32xf32, #tpu.memory_space<vmem>>, vector<2x32xf32>
    tpu.vector_store %arg11[%10, %c0_11], %8 {strides = array<i32>} : memref<16x32xf32, #tpu.memory_space<vmem>>, vector<2x32xf32>,
    %12 = arith.index_cast %9 : i32 to index
    %c0_12 = arith.constant 0 : index
    %13 = vector.load %arg10[%12, %c0_12] : memref<16x32xf32, #tpu.memory_space<vmem>>, vector<2x32xf32>
    %cst_13 = arith.constant dense<0.000000e+00> : vector<2x32xf32>
    %14 = tpu.matmul %8, %7, %cst_13 {dimension_numbers = #tpu.dot_dimension_numbers<[1], [0], [0], [1], [0, 0, 1, 1], [], []>} : vector<2x32xf32>, vector<32x32xf32>, vector<2x32xf32> -> vector<2x32xf32>
    %15 = arith.addf %13, %14 : vector<2x32xf32>
    %c1_i32 = arith.constant 1 : i32
    %c2_i32_14 = arith.constant 2 : i32
    %16 = arith.muli %c1_i32, %c2_i32_14 : i32
    %17 = arith.index_cast %16 : i32 to index
    %c0_15 = arith.constant 0 : index
    %18 = vector.load %arg11[%17, %c0_15] : memref<16x32xf32, #tpu.memory_space<vmem>>, vector<2x32xf32>
    tpu.vector_store %arg11[%17, %c0_15], %15 {strides = array<i32>} : memref<16x32xf32, #tpu.memory_space<vmem>>, vector<2x32xf32>,
    %19 = arith.index_cast %16 : i32 to index
    %c0_16 = arith.constant 0 : index
    %20 = vector.load %arg10[%19, %c0_16] : memref<16x32xf32, #tpu.memory_space<vmem>>, vector<2x32xf32>
    %cst_17 = arith.constant dense<0.000000e+00> : vector<2x32xf32>
    %21 = tpu.matmul %15, %7, %cst_17 {dimension_numbers = #tpu.dot_dimension_numbers<[1], [0], [0], [1], [0, 0, 1, 1], [], []>} : vector<2x32xf32>, vector<32x32xf32>, vector<2x32xf32> -> vector<2x32xf32>
    %22 = arith.addf %20, %21 : vector<2x32xf32>
    %c2_i32_18 = arith.constant 2 : i32
    %c2_i32_19 = arith.constant 2 : i32
    %23 = arith.muli %c2_i32_18, %c2_i32_19 : i32
    %24 = arith.index_cast %23 : i32 to index
    %c0_20 = arith.constant 0 : index
    %25 = vector.load %arg11[%24, %c0_20] : memref<16x32xf32, #tpu.memory_space<vmem>>, vector<2x32xf32>
    tpu.vector_store %arg11[%24, %c0_20], %22 {strides = array<i32>} : memref<16x32xf32, #tpu.memory_space<vmem>>, vector<2x32xf32>,
    %26 = arith.index_cast %23 : i32 to index
    %c0_21 = arith.constant 0 : index
    %27 = vector.load %arg10[%26, %c0_21] : memref<16x32xf32, #tpu.memory_space<vmem>>, vector<2x32xf32>
    %cst_22 = arith.constant dense<0.000000e+00> : vector<2x32xf32>
    %28 = tpu.matmul %22, %7, %cst_22 {dimension_numbers = #tpu.dot_dimension_numbers<[1], [0], [0], [1], [0, 0, 1, 1], [], []>} : vector<2x32xf32>, vector<32x32xf32>, vector<2x32xf32> -> vector<2x32xf32>
    %29 = arith.addf %27, %28 : vector<2x32xf32>
    %c3_i32 = arith.constant 3 : i32
    %c2_i32_23 = arith.constant 2 : i32
    %30 = arith.muli %c3_i32, %c2_i32_23 : i32
    %31 = arith.index_cast %30 : i32 to index
    %c0_24 = arith.constant 0 : index
    %32 = vector.load %arg11[%31, %c0_24] : memref<16x32xf32, #tpu.memory_space<vmem>>, vector<2x32xf32>
    tpu.vector_store %arg11[%31, %c0_24], %29 {strides = array<i32>} : memref<16x32xf32, #tpu.memory_space<vmem>>, vector<2x32xf32>,
    %33 = arith.index_cast %30 : i32 to index
    %c0_25 = arith.constant 0 : index
    %34 = vector.load %arg10[%33, %c0_25] : memref<16x32xf32, #tpu.memory_space<vmem>>, vector<2x32xf32>
    %cst_26 = arith.constant dense<0.000000e+00> : vector<2x32xf32>
    %35 = tpu.matmul %29, %7, %cst_26 {dimension_numbers = #tpu.dot_dimension_numbers<[1], [0], [0], [1], [0, 0, 1, 1], [], []>} : vector<2x32xf32>, vector<32x32xf32>, vector<2x32xf32> -> vector<2x32xf32>
    %36 = arith.addf %34, %35 : vector<2x32xf32>
    %c4_i32 = arith.constant 4 : i32
    %c2_i32_27 = arith.constant 2 : i32
    %37 = arith.muli %c4_i32, %c2_i32_27 : i32
    %38 = arith.index_cast %37 : i32 to index
    %c0_28 = arith.constant 0 : index
    %39 = vector.load %arg11[%38, %c0_28] : memref<16x32xf32, #tpu.memory_space<vmem>>, vector<2x32xf32>
    tpu.vector_store %arg11[%38, %c0_28], %36 {strides = array<i32>} : memref<16x32xf32, #tpu.memory_space<vmem>>, vector<2x32xf32>,
    %40 = arith.index_cast %37 : i32 to index
    %c0_29 = arith.constant 0 : index
    %41 = vector.load %arg10[%40, %c0_29] : memref<16x32xf32, #tpu.memory_space<vmem>>, vector<2x32xf32>
    %cst_30 = arith.constant dense<0.000000e+00> : vector<2x32xf32>
    %42 = tpu.matmul %36, %7, %cst_30 {dimension_numbers = #tpu.dot_dimension_numbers<[1], [0], [0], [1], [0, 0, 1, 1], [], []>} : vector<2x32xf32>, vector<32x32xf32>, vector<2x32xf32> -> vector<2x32xf32>
    %43 = arith.addf %41, %42 : vector<2x32xf32>
    %c5_i32 = arith.constant 5 : i32
    %c2_i32_31 = arith.constant 2 : i32
    %44 = arith.muli %c5_i32, %c2_i32_31 : i32
    %45 = arith.index_cast %44 : i32 to index
    %c0_32 = arith.constant 0 : index
    %46 = vector.load %arg11[%45, %c0_32] : memref<16x32xf32, #tpu.memory_space<vmem>>, vector<2x32xf32>
    tpu.vector_store %arg11[%45, %c0_32], %43 {strides = array<i32>} : memref<16x32xf32, #tpu.memory_space<vmem>>, vector<2x32xf32>,
    %47 = arith.index_cast %44 : i32 to index
    %c0_33 = arith.constant 0 : index
    %48 = vector.load %arg10[%47, %c0_33] : memref<16x32xf32, #tpu.memory_space<vmem>>, vector<2x32xf32>
    %cst_34 = arith.constant dense<0.000000e+00> : vector<2x32xf32>
    %49 = tpu.matmul %43, %7, %cst_34 {dimension_numbers = #tpu.dot_dimension_numbers<[1], [0], [0], [1], [0, 0, 1, 1], [], []>} : vector<2x32xf32>, vector<32x32xf32>, vector<2x32xf32> -> vector<2x32xf32>
    %50 = arith.addf %48, %49 : vector<2x32xf32>
    %c6_i32 = arith.constant 6 : i32
    %c2_i32_35 = arith.constant 2 : i32
    %51 = arith.muli %c6_i32, %c2_i32_35 : i32
    %52 = arith.index_cast %51 : i32 to index
    %c0_36 = arith.constant 0 : index
    %53 = vector.load %arg11[%52, %c0_36] : memref<16x32xf32, #tpu.memory_space<vmem>>, vector<2x32xf32>
    tpu.vector_store %arg11[%52, %c0_36], %50 {strides = array<i32>} : memref<16x32xf32, #tpu.memory_space<vmem>>, vector<2x32xf32>,
    %54 = arith.index_cast %51 : i32 to index
    %c0_37 = arith.constant 0 : index
    %55 = vector.load %arg10[%54, %c0_37] : memref<16x32xf32, #tpu.memory_space<vmem>>, vector<2x32xf32>
    %cst_38 = arith.constant dense<0.000000e+00> : vector<2x32xf32>
    %56 = tpu.matmul %50, %7, %cst_38 {dimension_numbers = #tpu.dot_dimension_numbers<[1], [0], [0], [1], [0, 0, 1, 1], [], []>} : vector<2x32xf32>, vector<32x32xf32>, vector<2x32xf32> -> vector<2x32xf32>
    %57 = arith.addf %55, %56 : vector<2x32xf32>
    %c7_i32 = arith.constant 7 : i32
    %c2_i32_39 = arith.constant 2 : i32
    %58 = arith.muli %c7_i32, %c2_i32_39 : i32
    %59 = arith.index_cast %58 : i32 to index
    %c0_40 = arith.constant 0 : index
    %60 = vector.load %arg11[%59, %c0_40] : memref<16x32xf32, #tpu.memory_space<vmem>>, vector<2x32xf32>
    tpu.vector_store %arg11[%59, %c0_40], %57 {strides = array<i32>} : memref<16x32xf32, #tpu.memory_space<vmem>>, vector<2x32xf32>,
    %61 = arith.index_cast %58 : i32 to index
    %c0_41 = arith.constant 0 : index
    %62 = vector.load %arg10[%61, %c0_41] : memref<16x32xf32, #tpu.memory_space<vmem>>, vector<2x32xf32>
    %cst_42 = arith.constant dense<0.000000e+00> : vector<2x32xf32>
    %63 = tpu.matmul %57, %7, %cst_42 {dimension_numbers = #tpu.dot_dimension_numbers<[1], [0], [0], [1], [0, 0, 1, 1], [], []>} : vector<2x32xf32>, vector<32x32xf32>, vector<2x32xf32> -> vector<2x32xf32>
    %64 = arith.addf %62, %63 : vector<2x32xf32>
    %c8_i32 = arith.constant 8 : i32
    %c0_43 = arith.constant 0 : index
    %c0_44 = arith.constant 0 : index
    %65 = vector.load %arg9[%c0_43, %c0_44] : memref<2x32xf32, #tpu.memory_space<vmem>>, vector<2x32xf32>
    tpu.vector_store %arg9[%c0_43, %c0_44], %64 {strides = array<i32>} : memref<2x32xf32, #tpu.memory_space<vmem>>, vector<2x32xf32>,
    %c0_45 = arith.constant 0 : index
    %c0_46 = arith.constant 0 : index
    %66 = vector.load %arg3[%c0_45, %c0_46] : memref<16x8xf32, #tpu.memory_space<vmem>>, vector<16x8xf32>
    %cst_47 = arith.constant dense<0.000000e+00> : vector<16x8xf32>
    %67 = tpu.matmul %0, %66, %cst_47 {dimension_numbers = #tpu.dot_dimension_numbers<[1], [0], [0], [1], [0, 0, 1, 1], [], []>} : vector<16x16xf32>, vector<16x8xf32>, vector<16x8xf32> -> vector<16x8xf32>
    %c0_48 = arith.constant 0 : index
    %c0_49 = arith.constant 0 : index
    %68 = vector.load %arg11[%c0_48, %c0_49] : memref<16x32xf32, #tpu.memory_space<vmem>>, vector<16x32xf32>
    %c0_50 = arith.constant 0 : index
    %c0_51 = arith.constant 0 : index
    %69 = vector.load %arg5[%c0_50, %c0_51] : memref<32x8xf32, #tpu.memory_space<vmem>>, vector<32x8xf32>
    %cst_52 = arith.constant dense<0.000000e+00> : vector<16x8xf32>
    %70 = tpu.matmul %68, %69, %cst_52 {dimension_numbers = #tpu.dot_dimension_numbers<[1], [0], [0], [1], [0, 0, 1, 1], [], []>} : vector<16x32xf32>, vector<32x8xf32>, vector<16x8xf32> -> vector<16x8xf32>
    %71 = arith.addf %67, %70 : vector<16x8xf32>
    %c0_53 = arith.constant 0 : index
    %c0_54 = arith.constant 0 : index
    %72 = vector.load %arg7[%c0_53, %c0_54] : memref<1x8xf32, #tpu.memory_space<vmem>>, vector<1x8xf32>
    %73 = vector.broadcast %72 : vector<1x8xf32> to vector<16x8xf32>
    %74 = arith.addf %71, %73 : vector<16x8xf32>
    %cst_55 = arith.constant dense<0xFF800000> : vector<16xf32>
    %75 = vector.multi_reduction <maximumf>, %74, %cst_55 [1] : vector<16x8xf32> to vector<16xf32>
    %76 = vector.shape_cast %75 : vector<16xf32> to vector<16x1xf32>
    %77 = vector.broadcast %76 : vector<16x1xf32> to vector<16x8xf32>
    %78 = arith.subf %74, %77 : vector<16x8xf32>
    %79 = math.exp %78 : vector<16x8xf32>
    %cst_56 = arith.constant dense<0.000000e+00> : vector<16xf32>
    %80 = vector.multi_reduction <add>, %79, %cst_56 [1] : vector<16x8xf32> to vector<16xf32>
    %81 = vector.shape_cast %80 : vector<16xf32> to vector<16x1xf32>
    %82 = math.log %81 : vector<16x1xf32>
    %83 = vector.broadcast %82 : vector<16x1xf32> to vector<16x8xf32>
    %84 = arith.subf %78, %83 : vector<16x8xf32>
    %c0_57 = arith.constant 0 : index
    %c0_58 = arith.constant 0 : index
    %85 = vector.load %arg8[%c0_57, %c0_58] : memref<16x8xf32, #tpu.memory_space<vmem>>, vector<16x8xf32>
    tpu.vector_store %arg8[%c0_57, %c0_58], %84 {strides = array<i32>} : memref<16x8xf32, #tpu.memory_space<vmem>>, vector<16x8xf32>,
    return
  }
}

</mosaic_0001>

<bundles_post_ra>
// kernel: rnn_sequence_forward.1
= control target key start
LH: loop header
LB: loop body
LE: loop exit
PB: predicated region body
PF: predicated region fallthrough
CT: control target
= control target key end

     0   :  { %15 = vsyncpa [#allocation5], 0  ;;  %s1492_s0 = inlined_call_operand.vmem [shape: f32[16,16], index: 0, kind: input, shape index: {}]   ;;  %s1493_s1 = inlined_call_operand.hbm [shape: f32[2,32], index: 1, kind: input, shape index: {}]   ;;  %s1494_s2 = inlined_call_operand.vmem [shape: f32[16,32], index: 2, kind: input, shape index: {}]   ;;  %s1495_s3 = inlined_call_operand.vmem [shape: f32[16,8], index: 3, kind: input, shape index: {}]   ;;  %s1496_s4 = inlined_call_operand.vmem [shape: f32[32,32], index: 4, kind: input, shape index: {}]   ;;  %s1497_s5 = inlined_call_operand.vmem [shape: f32[32,8], index: 5, kind: input, shape index: {}]   ;;  %s1498_s6 = inlined_call_operand.vmem [shape: f32[1,32], index: 6, kind: input, shape index: {}]   ;;  %s1499_s7 = inlined_call_operand.vmem [shape: f32[1,8], index: 7, kind: input, shape index: {}]   ;;  %s1500_s8 = inlined_call_operand.hbm [shape: f32[16,8], index: 8, kind: output, shape index: {0}]   ;;  %s1501_s9 = inlined_call_operand.hbm [shape: f32[2,32], index: 9, kind: output, shape index: {1}]  }
   0x1   :  { %16 = vsyncpa [#allocation6], 0 }
   0x2   :  { %17 = vsyncpa [#allocation9], 0  ;;  %s1251_s30 = smov [#allocation4]  }
   0x3   :  { %s26_s10 = sshll.u32 %s1251_s30, 4  ;;  %s27_s10 = int_to_ptr.vmem [resolvable:$true] %s26_s10 }
   0x4   :  { %s1193_s11 = scalar_lea.vmem %s27_s10, 32  ;;  %p1198_p1 = scmp.lt.s32.totalorder %s27_s10, %s27_s10 }
   0x5   :  { %p1194_p0 = scmp.ne.s32.totalorder %s27_s10, %s1193_s11  ;;  %p1199_p2 = scmp.lt.s32.totalorder %s1193_s11, %s1193_s11 }
   0x7   :  { %p1200_p3 = por %p1199_p2, %p1198_p1 }
   0x9   :  { %p1201_p4 = pnand %p1200_p3, %p1194_p0 }
   0xb   :  { %1204 = shalt.err (!%p1201_p4)
}
   0xc   :  { %29 = dma.hbm_to_vmem [thread:$0]  %s1493_s1, 32, %s27_s10, [#allocation5]  }
   0xd   :  { %1245 = dma.done.wait [#allocation5], 32  }
   0xe   :  { %1246 = vsyncadd [#allocation5], 4294967264  ;;  %v1252_v0 = vmov 0.0   ;;  %vm1253_vm0 = vmmov 0   ;;  %vm56_vm1 = vcmask 130048   ;;  %v48_v1 = vld [vmem:[%s1494_s2 + $0x8] sm:$0xff] }
   0xf   :  { %1064 = vmatprep.subr.mxu1 %v1252_v0  ;;  %1072 = vmatprep.mubr.msk.f32.mxu1 %vm1253_vm0, %v1252_v0  ;;  %v47_v2 = vld [vmem:[%s1494_s2] sm:$0xff]  ;;  %v1330_v4 = vld [vmem:[%s1496_s4 + $0x18] sm:$0xff]  ;;  %v1335_v5 = vld [vmem:[%s1496_s4 + $0x10] sm:$0xff]  ;;  %vm146_vm2 = vcmask 254976   ;;  %vm138_vm3 = vcmask 261120   ;;  %vm929_vm4 = vcmask 64512  }
  0x10   :  { %v1323_v3 = vld [vmem:[%s1492_s0] sm:$0xff]  ;;  %1057 = vmatprep.subr.mxu0 %v48_v1  ;;  %v1340_v6 = vld [vmem:[%s1492_s0 + $0x8] sm:$0xff]  ;;  %1065 = vmatpush3.msra.mxu1 %v1330_v4  ;;  %v763_v40 = vld [vmem:[%s1497_s5 + $0x18] sm:$0xff] }
  0x11   :  { %1061 = vmatprep.mubr.msk.f32.mxu0 %vm56_vm1, %v1323_v3  ;;  %1058 = vmatpush3.msra.mxu0 %v48_v1  ;;  %v145_v7 = vld [vmem:[#allocation4] sm:$0x3]  ;;  %v1347_v8 = vld [vmem:[%s1496_s4 + $0x8] sm:$0xff]  ;;  %v762_v41 = vld [vmem:[%s1497_s5 + $0x10] sm:$0xff] }
  0x12   :  { %1059 = vmatprep.subr.mxu0 %v47_v2  ;;  %1066 = vmatprep.subr.mxu1 %v1252_v0  ;;  %147 = vst.msk [vmem:[#allocation3] sm:$0x3] %vm146_vm2, %v145_v7  ;;  %v1357_v9 = vld [vmem:[%s1496_s4] sm:$0xff]  ;;  %v757_v42 = vld [vmem:[%s1495_s3 + $0x8] sm:$0xff] }
  0x13   :  { %1060 = vmatpush3.msra.mxu0 %v47_v2  ;;  %1067 = vmatpush3.msra.mxu1 %v1335_v5  ;;  %v987_v10 = vld [vmem:[%s1498_s6] ss:$0 sm:$0xff]  ;;  %v761_v43 = vld [vmem:[%s1497_s5 + $0x8] sm:$0xff] }
  0x14   :  { %1062 = vmatmul.mubr.msk.f32.vlgmr.msra.gmra.mxu0 %vm56_vm1, %v1340_v6  ;;  %1068 = vmatprep.subr.mxu1 %v1252_v0  ;;  %v760_v44 = vld [vmem:[%s1497_s5] sm:$0xff] }
  0x15   :  { %1069 = vmatpush3.msra.mxu1 %v1347_v8  ;;  %1075 = vmatprep.subr.mxu0 %v1252_v0  ;;  %v756_v49 = vld [vmem:[%s1495_s3] sm:$0xff] }
  0x16   :  { %1070 = vmatprep.subr.mxu1 %v1252_v0  ;;  %1076 = vmatpush3.msra.mxu0 %v1330_v4  ;;  %v1002_v61 = vld [vmem:[%s1499_s7] ss:$0 sm:$0xff]  ;;  %s1254_s7 = smov [#allocation8]  }
  0x17   :  { %1071 = vmatpush3.msra.mxu1 %v1357_v9  ;;  %1077 = vmatprep.subr.mxu0 %v1252_v0  ;;  %s974_s18 = sshll.u32 %s1254_s7, 4  ;;  %s975_s18 = int_to_ptr.vmem [resolvable:$true] %s974_s18 }
  0x18   :  { %1073 = vmatmul.mubr.msk.f32.vlgmr.msra.gmra.mxu1 %vm138_vm3, %v145_v7  ;;  %1078 = vmatpush3.msra.mxu0 %v1335_v5  ;;  %s1205_s1 = scalar_lea.vmem %s975_s18, 32  ;;  %p1210_p6 = scmp.lt.s32.totalorder %s975_s18, %s975_s18 }
  0x19   :  { %1079 = vmatprep.subr.mxu0 %v1252_v0  ;;  %1083 = vmatprep.mubr.msk.f32.mxu0 %vm1253_vm0, %v1252_v0  ;;  %p1206_p5 = scmp.ne.s32.totalorder %s975_s18, %s1205_s1  ;;  %p1211_p7 = scmp.lt.s32.totalorder %s1205_s1, %s1205_s1 }
  0x1a   :  { %1080 = vmatpush3.msra.mxu0 %v1347_v8  ;;  %1086 = vmatprep.subr.mxu1 %v1252_v0 }
  0x1b   :  { %1081 = vmatprep.subr.mxu0 %v1252_v0  ;;  %1087 = vmatpush3.msra.mxu1 %v1330_v4  ;;  %p1212_p8 = por %p1211_p7, %p1210_p6 }
  0x1c   :  { %1082 = vmatpush3.msra.mxu0 %v1357_v9  ;;  %1088 = vmatprep.subr.mxu1 %v1252_v0 }
  0x1d   :  { %1089 = vmatpush3.msra.mxu1 %v1335_v5  ;;  %1094 = vmatprep.mubr.msk.f32.mxu1 %vm1253_vm0, %v1252_v0  ;;  %p1213_p9 = pnand %p1212_p8, %p1206_p5 }
  0x1e   :  { %1090 = vmatprep.subr.mxu1 %v1252_v0  ;;  %1097 = vmatprep.subr.mxu0 %v1252_v0 }
  0x1f   :  { %1091 = vmatpush3.msra.mxu1 %v1347_v8 }
  0x20   :  { %1092 = vmatprep.subr.mxu1 %v1252_v0 }
  0x21   :  { %1093 = vmatpush3.msra.mxu1 %v1357_v9 }
  0x22   :  { %1108 = vmatprep.subr.mxu1 %v1252_v0 }
  0xd4   :  { %v1063_v11 = vpop.f32.mrf.mxu0 }
  0xd5   :  { %v135_v12 = vadd.f32 %v1063_v11, %v987_v10 }
  0xd6   :  { %v129_v13 = vpop.f32.mrf.mxu0 }
  0xd7   :  { %140 = vst.msk [vmem:[#allocation2 + $0x8] sm:$0xff] %vm138_vm3, %v135_v12  ;;  %v130_v14 = vadd.f32 %v987_v10, %v129_v13 }
  0xd8   :  { %v218_v15 = vpop.f32.mrf.mxu1 }
  0xd9   :  { %139 = vst.msk [vmem:[#allocation2] sm:$0xff] %vm138_vm3, %v130_v14 }
  0xda   :  { %v1074_v16 = vpop.f32.mrf.mxu1 }
  0xde   :  { %v452_v31 = vld [vmem:[#allocation2 + $0x8] sm:$0x3]  ;;  %v528_v35 = vld [vmem:[#allocation2 + $0xa] sm:$0x3]  ;;  %v604_v45 = vld [vmem:[#allocation2 + $0xc] sm:$0x3] }
  0xdf   :  { %v680_v51 = vld [vmem:[#allocation2 + $0xe] sm:$0x3] }
  0xe0   :  { %v148_v17 = vld [vmem:[#allocation2] sm:$0x3]  ;;  %v224_v19 = vld [vmem:[#allocation2 + $0x2] sm:$0x3]  ;;  %v300_v23 = vld [vmem:[#allocation2 + $0x4] sm:$0x3] }
  0xe1   :  { %v222_v18 = vadd.f32 %v218_v15, %v148_v17  ;;  %v376_v27 = vld [vmem:[#allocation2 + $0x6] sm:$0x3] }
  0xe3   :  { %223 = vst.msk [vmem:[#allocation3 + $0x2] sm:$0x3] %vm146_vm2, %v222_v18  ;;  %1084 = vmatmul.mubr.msk.f32.vlgmr.msra.gmra.mxu0 %vm138_vm3, %v222_v18 }
  0xe4   :  { %1098 = vmatpush3.msra.mxu0 %v1330_v4  ;;  %1105 = vmatprep.mubr.msk.f32.mxu0 %vm1253_vm0, %v1252_v0 }
  0xe5   :  { %1099 = vmatprep.subr.mxu0 %v1252_v0 }
  0xe6   :  { %1100 = vmatpush3.msra.mxu0 %v1335_v5 }
  0xe7   :  { %1101 = vmatprep.subr.mxu0 %v1252_v0 }
  0xe8   :  { %1102 = vmatpush3.msra.mxu0 %v1347_v8 }
  0xe9   :  { %1103 = vmatprep.subr.mxu0 %v1252_v0 }
  0xea   :  { %1104 = vmatpush3.msra.mxu0 %v1357_v9 }
  0xeb   :  { %1119 = vmatprep.subr.mxu0 %v1252_v0 }
 0x1a3   :  { %v294_v20 = vpop.f32.mrf.mxu0 }
 0x1a4   :  { %v298_v21 = vadd.f32 %v294_v20, %v224_v19 }
 0x1a5   :  { %v1085_v22 = vpop.f32.mrf.mxu0 }
 0x1a6   :  { %299 = vst.msk [vmem:[#allocation3 + $0x4] sm:$0x3] %vm146_vm2, %v298_v21  ;;  %1095 = vmatmul.mubr.msk.f32.vlgmr.msra.gmra.mxu1 %vm138_vm3, %v298_v21 }
 0x1a7   :  { %1109 = vmatpush3.msra.mxu1 %v1330_v4  ;;  %1116 = vmatprep.mubr.msk.f32.mxu1 %vm1253_vm0, %v1252_v0 }
 0x1a8   :  { %1110 = vmatprep.subr.mxu1 %v1252_v0 }
 0x1a9   :  { %1111 = vmatpush3.msra.mxu1 %v1335_v5 }
 0x1aa   :  { %1112 = vmatprep.subr.mxu1 %v1252_v0 }
 0x1ab   :  { %1113 = vmatpush3.msra.mxu1 %v1347_v8 }
 0x1ac   :  { %1114 = vmatprep.subr.mxu1 %v1252_v0 }
 0x1ad   :  { %1115 = vmatpush3.msra.mxu1 %v1357_v9 }
 0x1ae   :  { %1130 = vmatprep.subr.mxu1 %v1252_v0 }
 0x266   :  { %v370_v24 = vpop.f32.mrf.mxu1 }
 0x267   :  { %v374_v25 = vadd.f32 %v370_v24, %v300_v23 }
 0x268   :  { %v1096_v26 = vpop.f32.mrf.mxu1 }
 0x269   :  { %375 = vst.msk [vmem:[#allocation3 + $0x6] sm:$0x3] %vm146_vm2, %v374_v25  ;;  %1106 = vmatmul.mubr.msk.f32.vlgmr.msra.gmra.mxu0 %vm138_vm3, %v374_v25 }
 0x26a   :  { %1120 = vmatpush3.msra.mxu0 %v1330_v4  ;;  %1127 = vmatprep.mubr.msk.f32.mxu0 %vm1253_vm0, %v1252_v0 }
 0x26b   :  { %1121 = vmatprep.subr.mxu0 %v1252_v0 }
 0x26c   :  { %1122 = vmatpush3.msra.mxu0 %v1335_v5 }
 0x26d   :  { %1123 = vmatprep.subr.mxu0 %v1252_v0 }
 0x26e   :  { %1124 = vmatpush3.msra.mxu0 %v1347_v8 }
 0x26f   :  { %1125 = vmatprep.subr.mxu0 %v1252_v0 }
 0x270   :  { %1126 = vmatpush3.msra.mxu0 %v1357_v9  ;;  %v758_v39 = vld [vmem:[#allocation3] sm:$0xff] }
 0x271   :  { %1141 = vmatprep.subr.mxu0 %v1252_v0 }
 0x329   :  { %v446_v28 = vpop.f32.mrf.mxu0 }
 0x32a   :  { %v450_v29 = vadd.f32 %v446_v28, %v376_v27 }
 0x32b   :  { %v1107_v30 = vpop.f32.mrf.mxu0 }
 0x32c   :  { %451 = vst.msk [vmem:[#allocation3 + $0x8] sm:$0x3] %vm146_vm2, %v450_v29  ;;  %1117 = vmatmul.mubr.msk.f32.vlgmr.msra.gmra.mxu1 %vm138_vm3, %v450_v29 }
 0x32d   :  { %1131 = vmatpush3.msra.mxu1 %v1330_v4  ;;  %1138 = vmatprep.mubr.msk.f32.mxu1 %vm1253_vm0, %v1252_v0 }
 0x32e   :  { %1132 = vmatprep.subr.mxu1 %v1252_v0 }
 0x32f   :  { %1133 = vmatpush3.msra.mxu1 %v1335_v5 }
 0x330   :  { %1134 = vmatprep.subr.mxu1 %v1252_v0 }
 0x331   :  { %1135 = vmatpush3.msra.mxu1 %v1347_v8 }
 0x332   :  { %1136 = vmatprep.subr.mxu1 %v1252_v0 }
 0x333   :  { %1137 = vmatpush3.msra.mxu1 %v1357_v9 }
 0x334   :  { %1152 = vmatprep.subr.mxu1 %v763_v40 }
 0x3ec   :  { %v522_v32 = vpop.f32.mrf.mxu1 }
 0x3ed   :  { %v526_v33 = vadd.f32 %v522_v32, %v452_v31 }
 0x3ee   :  { %v1118_v34 = vpop.f32.mrf.mxu1 }
 0x3ef   :  { %527 = vst.msk [vmem:[#allocation3 + $0xa] sm:$0x3] %vm146_vm2, %v526_v33  ;;  %1128 = vmatmul.mubr.msk.f32.vlgmr.msra.gmra.mxu0 %vm138_vm3, %v526_v33 }
 0x3f0   :  { %1142 = vmatpush3.msra.mxu0 %v1330_v4  ;;  %1149 = vmatprep.mubr.msk.f32.mxu0 %vm1253_vm0, %v1252_v0 }
 0x3f1   :  { %1143 = vmatprep.subr.mxu0 %v1252_v0 }
 0x3f2   :  { %1144 = vmatpush3.msra.mxu0 %v1335_v5 }
 0x3f3   :  { %1145 = vmatprep.subr.mxu0 %v1252_v0 }
 0x3f4   :  { %1146 = vmatpush3.msra.mxu0 %v1347_v8 }
 0x3f5   :  { %1147 = vmatprep.subr.mxu0 %v1252_v0 }
 0x3f6   :  { %1148 = vmatpush3.msra.mxu0 %v1357_v9 }
 0x3f7   :  { %1163 = vmatprep.subr.mxu0 %v757_v42 }
 0x4af   :  { %v598_v36 = vpop.f32.mrf.mxu0 }
 0x4b0   :  { %v602_v37 = vadd.f32 %v598_v36, %v528_v35 }
 0x4b1   :  { %v1129_v38 = vpop.f32.mrf.mxu0 }
 0x4b2   :  { %603 = vst.msk [vmem:[#allocation3 + $0xc] sm:$0x3] %vm146_vm2, %v602_v37  ;;  %1139 = vmatmul.mubr.msk.f32.vlgmr.msra.gmra.mxu1 %vm138_vm3, %v602_v37 }
 0x4b3   :  { %1160 = vmatprep.mubr.msk.f32.mxu1 %vm138_vm3, %v758_v39  ;;  %1153 = vmatpush3.msra.mxu1 %v763_v40 }
 0x4b4   :  { %1154 = vmatprep.subr.mxu1 %v762_v41 }
 0x4b5   :  { %1155 = vmatpush3.msra.mxu1 %v762_v41 }
 0x4b6   :  { %1156 = vmatprep.subr.mxu1 %v761_v43 }
 0x4b7   :  { %1157 = vmatpush3.msra.mxu1 %v761_v43 }
 0x4b8   :  { %1158 = vmatprep.subr.mxu1 %v760_v44 }
 0x4b9   :  { %1159 = vmatpush3.msra.mxu1 %v760_v44 }
 0x572   :  { %v674_v46 = vpop.f32.mrf.mxu1 }
 0x573   :  { %v678_v47 = vadd.f32 %v674_v46, %v604_v45 }
 0x574   :  { %v1140_v48 = vpop.f32.mrf.mxu1 }
 0x575   :  { %679 = vst.msk [vmem:[#allocation3 + $0xe] sm:$0x3] %vm146_vm2, %v678_v47  ;;  %1150 = vmatmul.mubr.msk.f32.vlgmr.msra.gmra.mxu0 %vm138_vm3, %v678_v47 }
 0x576   :  { %1164 = vmatpush3.msra.mxu0 %v757_v42  ;;  %1167 = vmatprep.mubr.msk.f32.mxu0 %vm56_vm1, %v1323_v3 }
 0x577   :  { %1165 = vmatprep.subr.mxu0 %v756_v49 }
 0x578   :  { %1166 = vmatpush3.msra.mxu0 %v756_v49 }
 0x579   :  { %1168 = vmatmul.mubr.msk.f32.vlgmr.msra.gmra.mxu0 %vm56_vm1, %v1340_v6 }
 0x57c   :  { %v759_v50 = vld [vmem:[#allocation3 + $0x8] sm:$0xff] }
 0x57d   :  { %1161 = vmatmul.mubr.msk.f32.vlgmr.msra.gmra.mxu1 %vm138_vm3, %v759_v50 }
 0x635   :  { %v750_v52 = vpop.f32.mrf.mxu0 }
 0x636   :  { %v754_v53 = vadd.f32 %v750_v52, %v680_v51 }
 0x637   :  { %v1151_v54 = vpop.f32.mrf.mxu0 }
 0x638   :  { %755 = vst.msk [vmem:[#allocation8] sm:$0x3] %vm146_vm2, %v754_v53 }
 0x639   :  { %v1169_v55 = vpop.f32.mrf.mxu0 }
 0x63b   :  { %v911_v57 = vpop.f32.mrf.mxu0 }
 0x63d   :  { %v1162_v56 = vpop.f32.mrf.mxu1 }
 0x63e   :  { %v917_v59 = vadd.f32 %v1169_v55, %v1162_v56 }
 0x63f   :  { %v836_v58 = vpop.f32.mrf.mxu1 }
 0x640   :  { %v912_v60 = vadd.f32 %v911_v57, %v836_v58  ;;  %v928_v0 = vadd.f32 %v1002_v61, %v917_v59 }
 0x642   :  { %v927_v62 = vadd.f32 %v1002_v61, %v912_v60  ;;  %v933_v1 = vsel %vm929_vm4, %v928_v0, -inf }
 0x644   :  { %v930_v63 = vsel %vm929_vm4, %v927_v62, -inf }
 0x645   :  { %931 = vmax.xlane.f32.xlu0 %v930_v63 }
 0x649   :  { %934 = vmax.xlane.f32.xlu0 %v933_v1 }
 0x6ce   :  { %v932_v2 = vpop.xlane.xlu0 %931 }
 0x6cf   :  { %v936_v3 = vsub.f32 %v927_v62, %v932_v2 }
 0x6d1   :  { %v938_v4 = vmul.f32 1.442695, %v936_v3 }
 0x6d2   :  { %v935_v5 = vpop.xlane.xlu0 %934 }
 0x6d3   :  { %1177 = vpow2.f32 %v938_v4  ;;  %v937_v6 = vsub.f32 %v928_v0, %v935_v5 }
 0x6d5   :  { %v940_v7 = vmul.f32 1.442695, %v937_v6 }
 0x6d7   :  { %1179 = vpow2.f32 %v940_v7 }
 0x6e0   :  { %v1178_v8 = vpop.eup %1177 }
 0x6e1   :  { %v942_v9 = vsel %vm929_vm4, %v1178_v8, 0.0 }
 0x6e2   :  { %943 = vadd.xlane.f32.xlu1 %v942_v9 }
 0x6e4   :  { %v1180_v10 = vpop.eup %1179 }
 0x6e5   :  { %v945_v11 = vsel %vm929_vm4, %v1180_v10, 0.0 }
 0x6e6   :  { %946 = vadd.xlane.f32.xlu1 %v945_v11 }
 0x6e7   :  { %1216 = shalt.err (!%p1213_p9)
}
 0x6e8   :  { %977 = dma.vmem_to_hbm [thread:$0]  %s975_s18, 32, %s1501_s9, [#allocation9]  }
 0x6e9   :  { %s1255_s21 = smov [#allocation7]  }
 0x6ea   :  { %s961_s22 = sshll.u32 %s1255_s21, 4  ;;  %s962_s22 = int_to_ptr.vmem [resolvable:$true] %s961_s22 }
 0x6eb   :  { %s1225_s2 = scalar_lea.vmem %s962_s22, 256  ;;  %p1230_p11 = scmp.lt.s32.totalorder %s962_s22, %s962_s22 }
 0x6ec   :  { %p1226_p10 = scmp.ne.s32.totalorder %s962_s22, %s1225_s2  ;;  %p1231_p12 = scmp.lt.s32.totalorder %s1225_s2, %s1225_s2 }
 0x6ee   :  { %p1232_p13 = por %p1231_p12, %p1230_p11 }
 0x6f0   :  { %p1233_p0 = pnand %p1232_p13, %p1226_p10 }
 0x76b   :  { %v944_v12 = vpop.xlane.xlu1 %943 }
 0x76c   :  { %1181 = vlog2.f32 %v944_v12 }
 0x76f   :  { %v947_v13 = vpop.xlane.xlu1 %946 }
 0x770   :  { %1183 = vlog2.f32 %v947_v13 }
 0x779   :  { %v1182_v14 = vpop.eup %1181 }
 0x77a   :  { %v949_v15 = vmul.f32 0.6931472, %v1182_v14 }
 0x77c   :  { %v952_v16 = vsub.f32 %v936_v3, %v949_v15 }
 0x77d   :  { %v1184_v17 = vpop.eup %1183 }
 0x77e   :  { %954 = vst.msk [vmem:[#allocation7] sm:$0xff] %vm929_vm4, %v952_v16  ;;  %v951_v18 = vmul.f32 0.6931472, %v1184_v17 }
 0x780   :  { %v953_v19 = vsub.f32 %v937_v6, %v951_v18 }
 0x782   :  { %955 = vst.msk [vmem:[#allocation7 + $0x8] sm:$0xff] %vm929_vm4, %v953_v19 }
 0x783   :  { %1236 = shalt.err (!%p1233_p0)
}
 0x784   :  { %s1256_s9 = smov 128   ;;  %s1257_s23 = smov 8  }
 0x785   :  { %967 = dma.vmem_to_hbm [thread:$0]  %s962_s22, 256, %s1500_s8, [#allocation6], %s1256_s9, %s1256_s9, %s1257_s23  }
 0x786   :  { %1247 = dma.done.wait [#allocation6], 256  }
 0x787   :  { %1248 = vsyncadd [#allocation6], 4294967040 }
 0x788   :  { %1249 = dma.done.wait [#allocation9], 32  }
 0x789   :  { %1250 = vsyncadd [#allocation9], 4294967264 }
 0x78a   :  { %984 = vsyncpa [#allocation5], 1 }
 0x78b   :  { %985 = vsyncpa [#allocation6], 1 }
 0x78c   :  { %986 = vsyncpa [#allocation9], 1 }

</bundles_post_ra>
